<compile_context>
chip_gen: v7x
topology: tpu7x:2x2x1
jax: 0.10.0
libtpu: 0.0.40
codegen_flags: <defaults>
</compile_context>

<pallas_src>
import jax
import jax.numpy as jnp
from jax import lax
from jax.experimental import pallas as pl
from jax.experimental.pallas import tpu as pltpu

C_IN = 5             # concat([rgb(3), dep(1), dep_MD(1)]) channels fed to backbone
C_GUIDE = 8          # guidance channels produced by backbone
C_OUT = 1 + C_GUIDE  # init_depth(1) + guide(C_GUIDE)

LANE = 128
MAX_BLOCK_ROWS = 512  # 512 rows x 128 lanes = 65536 px / grid step (~3.75 MiB HBM traffic)
CHUNK_ROWS = 32       # in-kernel row chunk (4 vregs per channel) to bound live ranges


def _round_up(x, m):
    return ((x + m - 1) // m) * m


def _choose_row_tile(n_rows, n_batch):
    """Largest block row count <= cap that divides n_rows and is (8,128)-dense
    (multiple of 8) or covers the whole row axis."""
    cap = MAX_BLOCK_ROWS
    if n_batch == 1 and n_rows >= 16:
        # Keep at least 2 grid steps so both v7x TensorCores get work.
        cap = min(cap, max(8, (n_rows // 2) // 8 * 8))
    if n_rows <= cap:
        return n_rows
    for d in range(cap - cap % 8, 7, -8):
        if n_rows % d == 0:
            return d
    return None  # caller pads n_rows to a multiple of 8 and retries


def _choose_chunk(r_tile):
    for c in (CHUNK_ROWS, 16, 8):
        if r_tile % c == 0:
            return c
    return r_tile


# ---------------------------------------------------------------------------
# Fused kernel: 1x1-conv backbone + SDR mask/blend/clamp epilogue.
# Block views (batch / unit-channel dims squeezed):
#   rgb_ref (3, R_TILE, 128), dep_ref (R_TILE, 128), md_ref (R_TILE, 128),
#   w_ref (45,) SMEM, b_ref (9,) SMEM
#   -> guide_ref (8, R_TILE, 128), pred_init_ref (R_TILE, 128), y_ref (R_TILE, 128)
# ---------------------------------------------------------------------------
def _make_sdr_kernel(r_tile, conventional):
    ch = _choose_chunk(r_tile)
    n_chunks = r_tile // ch

    def kernel(rgb_ref, dep_ref, md_ref, w_ref, b_ref,
               guide_ref, pred_init_ref, y_ref):
        # Hoist all 45 weight + 9 bias scalars out of the pixel loop
        # (SMEM -> sregs; broadcast into the VPU FMAs for free).
        w = [[w_ref[c * C_IN + k] for k in range(C_IN)] for c in range(C_OUT)]
        b = [b_ref[c] for c in range(C_OUT)]

        def body(j, carry):
            rows = pl.ds(pl.multiple_of(j * ch, ch), ch)
            r = rgb_ref[0, rows, :]
            g = rgb_ref[1, rows, :]
            bl = rgb_ref[2, rows, :]
            d = dep_ref[rows, :]
            m = md_ref[rows, :]

            def conv(c):
                # 1x1 conv, channels-major: scalar-broadcast FMAs only
                # (bias folded into the first one); no MXU for K=5.
                return ((w[c][0] * r + b[c]) + w[c][1] * g + w[c][2] * bl
                        + w[c][3] * d + w[c][4] * m)

            for cg in range(C_GUIDE):
                guide_ref[cg, rows, :] = conv(cg + 1)

            src = conv(0) if conventional else m   # args.mode branch (static)
            pred = jnp.where(d > 0.0, d, src)      # mask blend as one vselect
            pred_init_ref[rows, :] = pred
            y_ref[rows, :] = jnp.maximum(pred, 0.0)  # torch.clamp(min=0)
            return carry

        lax.fori_loop(0, n_chunks, body, None, unroll=True)

    return kernel


def sdr_fused(rgb4, dep4, md4, w_flat, b_flat, *, r_tile, conventional):
    """rgb4 (N,3,R,128), dep4/md4 (N,1,R,128), w_flat (45,), b_flat (9,)."""
    N, _, R, L = rgb4.shape
    assert L == LANE and R % r_tile == 0
    grid = (N, R // r_tile)

    def pix_spec(c):
        if c == 1:
            return pl.BlockSpec((None, None, r_tile, LANE), lambda n, t: (n, 0, t, 0))
        return pl.BlockSpec((None, c, r_tile, LANE), lambda n, t: (n, 0, t, 0))

    return pl.pallas_call(
        _make_sdr_kernel(r_tile, conventional),
        out_shape=(
            jax.ShapeDtypeStruct((N, C_GUIDE, R, LANE), jnp.float32),
            jax.ShapeDtypeStruct((N, 1, R, LANE), jnp.float32),
            jax.ShapeDtypeStruct((N, 1, R, LANE), jnp.float32),
        ),
        grid=grid,
        in_specs=[
            pix_spec(3),                                           # rgb
            pix_spec(1),                                           # dep
            pix_spec(1),                                           # dep_MD
            pl.BlockSpec(memory_space=pltpu.MemorySpace.SMEM),     # weights (scalars)
            pl.BlockSpec(memory_space=pltpu.MemorySpace.SMEM),     # bias (scalars)
        ],
        out_specs=(
            pix_spec(C_GUIDE),   # guidance
            pix_spec(1),         # pred_init
            pix_spec(1),         # y (clamped)
        ),
        compiler_params=pltpu.CompilerParams(
            dimension_semantics=("parallel", "parallel"),
            vmem_limit_bytes=32 * 1024 * 1024,
        ),
    )(rgb4, dep4, md4, w_flat, b_flat)


# ---------------------------------------------------------------------------
# SDR module wrapper
# ---------------------------------------------------------------------------
class SDRArgs:
    mode = "conventional"   # anything else -> dep_MD blend branch
    prop_time = 0           # SPN disabled (external module)


def init_params(key):
    kw, kb = jax.random.split(key)
    w = jax.random.normal(kw, (C_IN, C_OUT), dtype=jnp.float32) * 0.1
    b = jax.random.normal(kb, (1, C_OUT), dtype=jnp.float32) * 0.01
    return {"w": w, "b": b}


def sdr_forward(sample, params, args):
    rgb = sample["rgb"]          # (N, 3, H, W)
    dep = sample["dep"]          # (N, 1, H, W)
    dep_MD = sample["dep_MD"]    # (N, 1, H, W)
    mask_init = sample["mask_init"]
    num_sample = sample["num_sample"]
    N, _, H, W = rgb.shape
    hw = H * W

    # Lane-dense, channels-major layout: pad pixels only to a multiple of 128
    # lanes (usually a no-op, e.g. 640x480) and view the pixel axis as
    # (rows, 128). No NCHW<->NHWC transpose, no pad-to-tile.
    hw_pad = _round_up(hw, LANE)
    n_rows = hw_pad // LANE
    r_tile = _choose_row_tile(n_rows, N)
    if r_tile is None:
        # Rare: rows can't be tiled with 8-multiples; pad rows up to one (<=1023 px).
        hw_pad = _round_up(hw, 8 * LANE)
        n_rows = hw_pad // LANE
        r_tile = _choose_row_tile(n_rows, N) or 8
    pad = hw_pad - hw

    def to_blocks(x, c):
        x = x.reshape(N, c, hw)
        if pad:
            x = jnp.pad(x, ((0, 0), (0, 0), (0, pad)))
        return x.reshape(N, c, n_rows, LANE)

    rgb4 = to_blocks(rgb, 3)
    dep4 = to_blocks(dep, 1)
    md4 = to_blocks(dep_MD, 1)

    # Channels-major scalar parameters, flattened for SMEM residency.
    w_flat = params["w"].T.reshape(C_OUT * C_IN)    # w_flat[c*C_IN + k] = w[k, c]
    b_flat = params["b"].reshape(C_OUT)

    guide4, pred_init4, y4 = sdr_fused(
        rgb4, dep4, md4, w_flat, b_flat,
        r_tile=r_tile, conventional=(args.mode == "conventional"),
    )

    def from_blocks(x, c):
        x = x.reshape(N, c, hw_pad)
        if pad:
            x = x[:, :, :hw]
        return x.reshape(N, c, H, W)

    guide = from_blocks(guide4, C_GUIDE)
    pred_init = from_blocks(pred_init4, 1)
    y = from_blocks(y4, 1)

    y_inter = [pred_init]
    mask_inter = [mask_init]
    # TODO(synk): args.prop_time > 0 requires the external SPN `prop_layer`
    # module (not defined in SDR.py); only the prop_time == 0 path is implemented.
    y_inter = list(reversed(y_inter))
    mask_inter = list(reversed(mask_inter))

    return {
        "pred": y,
        "pred_init": pred_init,
        "pred_inter": y_inter,
        "mask_inter": mask_inter,
        "guidance": guide,
        "num_sample": num_sample,
    }


if __name__ == "__main__":
    key = jax.random.PRNGKey(0)
    k_rgb, k_dep, k_md, k_mask, k_param = jax.random.split(key, 5)

    N, H, W = 2, 16, 16
    rgb = jax.random.normal(k_rgb, (N, 3, H, W), dtype=jnp.float32)
    # sparse depth: ~30% valid, positive values
    valid = jax.random.bernoulli(k_mask, p=0.3, shape=(N, 1, H, W))
    dep = jnp.where(
        valid, jax.random.uniform(k_dep, (N, 1, H, W), minval=0.1, maxval=5.0), 0.0
    ).astype(jnp.float32)
    dep_MD = jax.random.uniform(
        k_md, (N, 1, H, W), minval=0.1, maxval=5.0
    ).astype(jnp.float32)
    mask_init = (dep > 0).astype(jnp.float32)
    num_sample = jnp.array([int(N * H * W * 0.3)], dtype=jnp.int32)

    sample = {
        "rgb": rgb,
        "dep": dep,
        "dep_MD": dep_MD,
        "mask_init": mask_init,
        "num_sample": num_sample,
    }

    args = SDRArgs()
    params = init_params(k_param)

    output = sdr_forward(sample, params, args)
    jax.block_until_ready(output["pred"])
    jax.block_until_ready(output["pred_init"])
    jax.block_until_ready(output["guidance"])

    # Cross-check the fused kernel against a pure-JAX reference.
    x = jnp.concatenate([rgb, dep, dep_MD], axis=1)
    x_flat = jnp.transpose(x, (0, 2, 3, 1)).reshape(N * H * W, C_IN)
    ref_out = (x_flat @ params["w"] + params["b"]).reshape(N, H, W, C_OUT)
    ref_out = jnp.transpose(ref_out, (0, 3, 1, 2))
    ref_init = ref_out[:, :1]
    ref_guide = ref_out[:, 1:]
    ref_mask = (dep > 0).astype(jnp.float32)
    ref_pred_init = ref_init * (1.0 - ref_mask) + dep * ref_mask
    ref_y = jnp.maximum(ref_pred_init, 0.0)
    assert jnp.allclose(output["guidance"], ref_guide, atol=1e-5)
    assert jnp.allclose(output["pred_init"], ref_pred_init, atol=1e-5)
    assert jnp.allclose(output["pred"], ref_y, atol=1e-5)

    print("KERNEL_OK")
</pallas_src>

<mosaic_0001>
module attributes {stable_mosaic.version = 11 : i64} {
  func.func @kernel(%arg0: i32, %arg1: i32, %arg2: memref<1x3x2x128xf32, #tpu.memory_space<vmem>>, %arg3: memref<1x1x2x128xf32, #tpu.memory_space<vmem>>, %arg4: memref<1x1x2x128xf32, #tpu.memory_space<vmem>>, %arg5: memref<45xf32, #tpu.memory_space<smem>>, %arg6: memref<9xf32, #tpu.memory_space<smem>>, %arg7: memref<1x8x2x128xf32, #tpu.memory_space<vmem>>, %arg8: memref<1x1x2x128xf32, #tpu.memory_space<vmem>>, %arg9: memref<1x1x2x128xf32, #tpu.memory_space<vmem>>) attributes {dimension_semantics = [#tpu.dimension_semantics<parallel>, #tpu.dimension_semantics<parallel>], iteration_bounds = array<i64: 2, 1>, scalar_prefetch = 0 : i64, scratch_operands = 0 : i64, tpu.core_type = #tpu.core_type<tc>, window_params = [{transform_indices = @transform_0, window_bounds = array<i64: 1, 3, 2, 128>}, {transform_indices = @transform_1, window_bounds = array<i64: 1, 1, 2, 128>}, {transform_indices = @transform_2, window_bounds = array<i64: 1, 1, 2, 128>}, {transform_indices = @transform_3, window_bounds = array<i64: 45>}, {transform_indices = @transform_4, window_bounds = array<i64: 9>}, {transform_indices = @transform_5, window_bounds = array<i64: 1, 8, 2, 128>}, {transform_indices = @transform_6, window_bounds = array<i64: 1, 1, 2, 128>}, {transform_indices = @transform_7, window_bounds = array<i64: 1, 1, 2, 128>}]} {
    %c0 = arith.constant 0 : index
    %0 = memref.load %arg5[%c0] : memref<45xf32, #tpu.memory_space<smem>>
    %c1 = arith.constant 1 : index
    %1 = memref.load %arg5[%c1] : memref<45xf32, #tpu.memory_space<smem>>
    %c2 = arith.constant 2 : index
    %2 = memref.load %arg5[%c2] : memref<45xf32, #tpu.memory_space<smem>>
    %c3 = arith.constant 3 : index
    %3 = memref.load %arg5[%c3] : memref<45xf32, #tpu.memory_space<smem>>
    %c4 = arith.constant 4 : index
    %4 = memref.load %arg5[%c4] : memref<45xf32, #tpu.memory_space<smem>>
    %c5 = arith.constant 5 : index
    %5 = memref.load %arg5[%c5] : memref<45xf32, #tpu.memory_space<smem>>
    %c6 = arith.constant 6 : index
    %6 = memref.load %arg5[%c6] : memref<45xf32, #tpu.memory_space<smem>>
    %c7 = arith.constant 7 : index
    %7 = memref.load %arg5[%c7] : memref<45xf32, #tpu.memory_space<smem>>
    %c8 = arith.constant 8 : index
    %8 = memref.load %arg5[%c8] : memref<45xf32, #tpu.memory_space<smem>>
    %c9 = arith.constant 9 : index
    %9 = memref.load %arg5[%c9] : memref<45xf32, #tpu.memory_space<smem>>
    %c10 = arith.constant 10 : index
    %10 = memref.load %arg5[%c10] : memref<45xf32, #tpu.memory_space<smem>>
    %c11 = arith.constant 11 : index
    %11 = memref.load %arg5[%c11] : memref<45xf32, #tpu.memory_space<smem>>
    %c12 = arith.constant 12 : index
    %12 = memref.load %arg5[%c12] : memref<45xf32, #tpu.memory_space<smem>>
    %c13 = arith.constant 13 : index
    %13 = memref.load %arg5[%c13] : memref<45xf32, #tpu.memory_space<smem>>
    %c14 = arith.constant 14 : index
    %14 = memref.load %arg5[%c14] : memref<45xf32, #tpu.memory_space<smem>>
    %c15 = arith.constant 15 : index
    %15 = memref.load %arg5[%c15] : memref<45xf32, #tpu.memory_space<smem>>
    %c16 = arith.constant 16 : index
    %16 = memref.load %arg5[%c16] : memref<45xf32, #tpu.memory_space<smem>>
    %c17 = arith.constant 17 : index
    %17 = memref.load %arg5[%c17] : memref<45xf32, #tpu.memory_space<smem>>
    %c18 = arith.constant 18 : index
    %18 = memref.load %arg5[%c18] : memref<45xf32, #tpu.memory_space<smem>>
    %c19 = arith.constant 19 : index
    %19 = memref.load %arg5[%c19] : memref<45xf32, #tpu.memory_space<smem>>
    %c20 = arith.constant 20 : index
    %20 = memref.load %arg5[%c20] : memref<45xf32, #tpu.memory_space<smem>>
    %c21 = arith.constant 21 : index
    %21 = memref.load %arg5[%c21] : memref<45xf32, #tpu.memory_space<smem>>
    %c22 = arith.constant 22 : index
    %22 = memref.load %arg5[%c22] : memref<45xf32, #tpu.memory_space<smem>>
    %c23 = arith.constant 23 : index
    %23 = memref.load %arg5[%c23] : memref<45xf32, #tpu.memory_space<smem>>
    %c24 = arith.constant 24 : index
    %24 = memref.load %arg5[%c24] : memref<45xf32, #tpu.memory_space<smem>>
    %c25 = arith.constant 25 : index
    %25 = memref.load %arg5[%c25] : memref<45xf32, #tpu.memory_space<smem>>
    %c26 = arith.constant 26 : index
    %26 = memref.load %arg5[%c26] : memref<45xf32, #tpu.memory_space<smem>>
    %c27 = arith.constant 27 : index
    %27 = memref.load %arg5[%c27] : memref<45xf32, #tpu.memory_space<smem>>
    %c28 = arith.constant 28 : index
    %28 = memref.load %arg5[%c28] : memref<45xf32, #tpu.memory_space<smem>>
    %c29 = arith.constant 29 : index
    %29 = memref.load %arg5[%c29] : memref<45xf32, #tpu.memory_space<smem>>
    %c30 = arith.constant 30 : index
    %30 = memref.load %arg5[%c30] : memref<45xf32, #tpu.memory_space<smem>>
    %c31 = arith.constant 31 : index
    %31 = memref.load %arg5[%c31] : memref<45xf32, #tpu.memory_space<smem>>
    %c32 = arith.constant 32 : index
    %32 = memref.load %arg5[%c32] : memref<45xf32, #tpu.memory_space<smem>>
    %c33 = arith.constant 33 : index
    %33 = memref.load %arg5[%c33] : memref<45xf32, #tpu.memory_space<smem>>
    %c34 = arith.constant 34 : index
    %34 = memref.load %arg5[%c34] : memref<45xf32, #tpu.memory_space<smem>>
    %c35 = arith.constant 35 : index
    %35 = memref.load %arg5[%c35] : memref<45xf32, #tpu.memory_space<smem>>
    %c36 = arith.constant 36 : index
    %36 = memref.load %arg5[%c36] : memref<45xf32, #tpu.memory_space<smem>>
    %c37 = arith.constant 37 : index
    %37 = memref.load %arg5[%c37] : memref<45xf32, #tpu.memory_space<smem>>
    %c38 = arith.constant 38 : index
    %38 = memref.load %arg5[%c38] : memref<45xf32, #tpu.memory_space<smem>>
    %c39 = arith.constant 39 : index
    %39 = memref.load %arg5[%c39] : memref<45xf32, #tpu.memory_space<smem>>
    %c40 = arith.constant 40 : index
    %40 = memref.load %arg5[%c40] : memref<45xf32, #tpu.memory_space<smem>>
    %c41 = arith.constant 41 : index
    %41 = memref.load %arg5[%c41] : memref<45xf32, #tpu.memory_space<smem>>
    %c42 = arith.constant 42 : index
    %42 = memref.load %arg5[%c42] : memref<45xf32, #tpu.memory_space<smem>>
    %c43 = arith.constant 43 : index
    %43 = memref.load %arg5[%c43] : memref<45xf32, #tpu.memory_space<smem>>
    %c44 = arith.constant 44 : index
    %44 = memref.load %arg5[%c44] : memref<45xf32, #tpu.memory_space<smem>>
    %c0_0 = arith.constant 0 : index
    %45 = memref.load %arg6[%c0_0] : memref<9xf32, #tpu.memory_space<smem>>
    %c1_1 = arith.constant 1 : index
    %46 = memref.load %arg6[%c1_1] : memref<9xf32, #tpu.memory_space<smem>>
    %c2_2 = arith.constant 2 : index
    %47 = memref.load %arg6[%c2_2] : memref<9xf32, #tpu.memory_space<smem>>
    %c3_3 = arith.constant 3 : index
    %48 = memref.load %arg6[%c3_3] : memref<9xf32, #tpu.memory_space<smem>>
    %c4_4 = arith.constant 4 : index
    %49 = memref.load %arg6[%c4_4] : memref<9xf32, #tpu.memory_space<smem>>
    %c5_5 = arith.constant 5 : index
    %50 = memref.load %arg6[%c5_5] : memref<9xf32, #tpu.memory_space<smem>>
    %c6_6 = arith.constant 6 : index
    %51 = memref.load %arg6[%c6_6] : memref<9xf32, #tpu.memory_space<smem>>
    %c7_7 = arith.constant 7 : index
    %52 = memref.load %arg6[%c7_7] : memref<9xf32, #tpu.memory_space<smem>>
    %c8_8 = arith.constant 8 : index
    %53 = memref.load %arg6[%c8_8] : memref<9xf32, #tpu.memory_space<smem>>
    %c0_i32 = arith.constant 0 : i32
    %c2_i32 = arith.constant 2 : i32
    %54 = arith.muli %c0_i32, %c2_i32 : i32
    %55 = tpu.assume_multiple %54, 2 : i32
    %c0_9 = arith.constant 0 : index
    %c0_10 = arith.constant 0 : index
    %56 = arith.index_cast %55 : i32 to index
    %c0_11 = arith.constant 0 : index
    %57 = vector.load %arg2[%c0_9, %c0_10, %56, %c0_11] : memref<1x3x2x128xf32, #tpu.memory_space<vmem>>, vector<1x1x2x128xf32>
    %58 = vector.shape_cast %57 : vector<1x1x2x128xf32> to vector<2x128xf32>
    %c0_12 = arith.constant 0 : index
    %c1_13 = arith.constant 1 : index
    %59 = arith.index_cast %55 : i32 to index
    %c0_14 = arith.constant 0 : index
    %60 = vector.load %arg2[%c0_12, %c1_13, %59, %c0_14] : memref<1x3x2x128xf32, #tpu.memory_space<vmem>>, vector<1x1x2x128xf32>
    %61 = vector.shape_cast %60 : vector<1x1x2x128xf32> to vector<2x128xf32>
    %c0_15 = arith.constant 0 : index
    %c2_16 = arith.constant 2 : index
    %62 = arith.index_cast %55 : i32 to index
    %c0_17 = arith.constant 0 : index
    %63 = vector.load %arg2[%c0_15, %c2_16, %62, %c0_17] : memref<1x3x2x128xf32, #tpu.memory_space<vmem>>, vector<1x1x2x128xf32>
    %64 = vector.shape_cast %63 : vector<1x1x2x128xf32> to vector<2x128xf32>
    %c0_18 = arith.constant 0 : index
    %c0_19 = arith.constant 0 : index
    %65 = arith.index_cast %55 : i32 to index
    %c0_20 = arith.constant 0 : index
    %66 = vector.load %arg3[%c0_18, %c0_19, %65, %c0_20] : memref<1x1x2x128xf32, #tpu.memory_space<vmem>>, vector<1x1x2x128xf32>
    %67 = vector.shape_cast %66 : vector<1x1x2x128xf32> to vector<2x128xf32>
    %c0_21 = arith.constant 0 : index
    %c0_22 = arith.constant 0 : index
    %68 = arith.index_cast %55 : i32 to index
    %c0_23 = arith.constant 0 : index
    %69 = vector.load %arg4[%c0_21, %c0_22, %68, %c0_23] : memref<1x1x2x128xf32, #tpu.memory_space<vmem>>, vector<1x1x2x128xf32>
    %70 = vector.shape_cast %69 : vector<1x1x2x128xf32> to vector<2x128xf32>
    %71 = vector.broadcast %5 : f32 to vector<2x128xf32>
    %72 = arith.mulf %71, %58 : vector<2x128xf32>
    %73 = vector.broadcast %46 : f32 to vector<2x128xf32>
    %74 = arith.addf %72, %73 : vector<2x128xf32>
    %75 = vector.broadcast %6 : f32 to vector<2x128xf32>
    %76 = arith.mulf %75, %61 : vector<2x128xf32>
    %77 = arith.addf %74, %76 : vector<2x128xf32>
    %78 = vector.broadcast %7 : f32 to vector<2x128xf32>
    %79 = arith.mulf %78, %64 : vector<2x128xf32>
    %80 = arith.addf %77, %79 : vector<2x128xf32>
    %81 = vector.broadcast %8 : f32 to vector<2x128xf32>
    %82 = arith.mulf %81, %67 : vector<2x128xf32>
    %83 = arith.addf %80, %82 : vector<2x128xf32>
    %84 = vector.broadcast %9 : f32 to vector<2x128xf32>
    %85 = arith.mulf %84, %70 : vector<2x128xf32>
    %86 = arith.addf %83, %85 : vector<2x128xf32>
    %c0_24 = arith.constant 0 : index
    %c0_25 = arith.constant 0 : index
    %87 = arith.index_cast %55 : i32 to index
    %c0_26 = arith.constant 0 : index
    %88 = vector.load %arg7[%c0_24, %c0_25, %87, %c0_26] : memref<1x8x2x128xf32, #tpu.memory_space<vmem>>, vector<1x1x2x128xf32>
    %89 = vector.shape_cast %88 : vector<1x1x2x128xf32> to vector<2x128xf32>
    %90 = vector.shape_cast %86 : vector<2x128xf32> to vector<1x1x2x128xf32>
    tpu.vector_store %arg7[%c0_24, %c0_25, %87, %c0_26], %90 {strides = array<i32>} : memref<1x8x2x128xf32, #tpu.memory_space<vmem>>, vector<1x1x2x128xf32>,
    %91 = vector.broadcast %10 : f32 to vector<2x128xf32>
    %92 = arith.mulf %91, %58 : vector<2x128xf32>
    %93 = vector.broadcast %47 : f32 to vector<2x128xf32>
    %94 = arith.addf %92, %93 : vector<2x128xf32>
    %95 = vector.broadcast %11 : f32 to vector<2x128xf32>
    %96 = arith.mulf %95, %61 : vector<2x128xf32>
    %97 = arith.addf %94, %96 : vector<2x128xf32>
    %98 = vector.broadcast %12 : f32 to vector<2x128xf32>
    %99 = arith.mulf %98, %64 : vector<2x128xf32>
    %100 = arith.addf %97, %99 : vector<2x128xf32>
    %101 = vector.broadcast %13 : f32 to vector<2x128xf32>
    %102 = arith.mulf %101, %67 : vector<2x128xf32>
    %103 = arith.addf %100, %102 : vector<2x128xf32>
    %104 = vector.broadcast %14 : f32 to vector<2x128xf32>
    %105 = arith.mulf %104, %70 : vector<2x128xf32>
    %106 = arith.addf %103, %105 : vector<2x128xf32>
    %c0_27 = arith.constant 0 : index
    %c1_28 = arith.constant 1 : index
    %107 = arith.index_cast %55 : i32 to index
    %c0_29 = arith.constant 0 : index
    %108 = vector.load %arg7[%c0_27, %c1_28, %107, %c0_29] : memref<1x8x2x128xf32, #tpu.memory_space<vmem>>, vector<1x1x2x128xf32>
    %109 = vector.shape_cast %108 : vector<1x1x2x128xf32> to vector<2x128xf32>
    %110 = vector.shape_cast %106 : vector<2x128xf32> to vector<1x1x2x128xf32>
    tpu.vector_store %arg7[%c0_27, %c1_28, %107, %c0_29], %110 {strides = array<i32>} : memref<1x8x2x128xf32, #tpu.memory_space<vmem>>, vector<1x1x2x128xf32>,
    %111 = vector.broadcast %15 : f32 to vector<2x128xf32>
    %112 = arith.mulf %111, %58 : vector<2x128xf32>
    %113 = vector.broadcast %48 : f32 to vector<2x128xf32>
    %114 = arith.addf %112, %113 : vector<2x128xf32>
    %115 = vector.broadcast %16 : f32 to vector<2x128xf32>
    %116 = arith.mulf %115, %61 : vector<2x128xf32>
    %117 = arith.addf %114, %116 : vector<2x128xf32>
    %118 = vector.broadcast %17 : f32 to vector<2x128xf32>
    %119 = arith.mulf %118, %64 : vector<2x128xf32>
    %120 = arith.addf %117, %119 : vector<2x128xf32>
    %121 = vector.broadcast %18 : f32 to vector<2x128xf32>
    %122 = arith.mulf %121, %67 : vector<2x128xf32>
    %123 = arith.addf %120, %122 : vector<2x128xf32>
    %124 = vector.broadcast %19 : f32 to vector<2x128xf32>
    %125 = arith.mulf %124, %70 : vector<2x128xf32>
    %126 = arith.addf %123, %125 : vector<2x128xf32>
    %c0_30 = arith.constant 0 : index
    %c2_31 = arith.constant 2 : index
    %127 = arith.index_cast %55 : i32 to index
    %c0_32 = arith.constant 0 : index
    %128 = vector.load %arg7[%c0_30, %c2_31, %127, %c0_32] : memref<1x8x2x128xf32, #tpu.memory_space<vmem>>, vector<1x1x2x128xf32>
    %129 = vector.shape_cast %128 : vector<1x1x2x128xf32> to vector<2x128xf32>
    %130 = vector.shape_cast %126 : vector<2x128xf32> to vector<1x1x2x128xf32>
    tpu.vector_store %arg7[%c0_30, %c2_31, %127, %c0_32], %130 {strides = array<i32>} : memref<1x8x2x128xf32, #tpu.memory_space<vmem>>, vector<1x1x2x128xf32>,
    %131 = vector.broadcast %20 : f32 to vector<2x128xf32>
    %132 = arith.mulf %131, %58 : vector<2x128xf32>
    %133 = vector.broadcast %49 : f32 to vector<2x128xf32>
    %134 = arith.addf %132, %133 : vector<2x128xf32>
    %135 = vector.broadcast %21 : f32 to vector<2x128xf32>
    %136 = arith.mulf %135, %61 : vector<2x128xf32>
    %137 = arith.addf %134, %136 : vector<2x128xf32>
    %138 = vector.broadcast %22 : f32 to vector<2x128xf32>
    %139 = arith.mulf %138, %64 : vector<2x128xf32>
    %140 = arith.addf %137, %139 : vector<2x128xf32>
    %141 = vector.broadcast %23 : f32 to vector<2x128xf32>
    %142 = arith.mulf %141, %67 : vector<2x128xf32>
    %143 = arith.addf %140, %142 : vector<2x128xf32>
    %144 = vector.broadcast %24 : f32 to vector<2x128xf32>
    %145 = arith.mulf %144, %70 : vector<2x128xf32>
    %146 = arith.addf %143, %145 : vector<2x128xf32>
    %c0_33 = arith.constant 0 : index
    %c3_34 = arith.constant 3 : index
    %147 = arith.index_cast %55 : i32 to index
    %c0_35 = arith.constant 0 : index
    %148 = vector.load %arg7[%c0_33, %c3_34, %147, %c0_35] : memref<1x8x2x128xf32, #tpu.memory_space<vmem>>, vector<1x1x2x128xf32>
    %149 = vector.shape_cast %148 : vector<1x1x2x128xf32> to vector<2x128xf32>
    %150 = vector.shape_cast %146 : vector<2x128xf32> to vector<1x1x2x128xf32>
    tpu.vector_store %arg7[%c0_33, %c3_34, %147, %c0_35], %150 {strides = array<i32>} : memref<1x8x2x128xf32, #tpu.memory_space<vmem>>, vector<1x1x2x128xf32>,
    %151 = vector.broadcast %25 : f32 to vector<2x128xf32>
    %152 = arith.mulf %151, %58 : vector<2x128xf32>
    %153 = vector.broadcast %50 : f32 to vector<2x128xf32>
    %154 = arith.addf %152, %153 : vector<2x128xf32>
    %155 = vector.broadcast %26 : f32 to vector<2x128xf32>
    %156 = arith.mulf %155, %61 : vector<2x128xf32>
    %157 = arith.addf %154, %156 : vector<2x128xf32>
    %158 = vector.broadcast %27 : f32 to vector<2x128xf32>
    %159 = arith.mulf %158, %64 : vector<2x128xf32>
    %160 = arith.addf %157, %159 : vector<2x128xf32>
    %161 = vector.broadcast %28 : f32 to vector<2x128xf32>
    %162 = arith.mulf %161, %67 : vector<2x128xf32>
    %163 = arith.addf %160, %162 : vector<2x128xf32>
    %164 = vector.broadcast %29 : f32 to vector<2x128xf32>
    %165 = arith.mulf %164, %70 : vector<2x128xf32>
    %166 = arith.addf %163, %165 : vector<2x128xf32>
    %c0_36 = arith.constant 0 : index
    %c4_37 = arith.constant 4 : index
    %167 = arith.index_cast %55 : i32 to index
    %c0_38 = arith.constant 0 : index
    %168 = vector.load %arg7[%c0_36, %c4_37, %167, %c0_38] : memref<1x8x2x128xf32, #tpu.memory_space<vmem>>, vector<1x1x2x128xf32>
    %169 = vector.shape_cast %168 : vector<1x1x2x128xf32> to vector<2x128xf32>
    %170 = vector.shape_cast %166 : vector<2x128xf32> to vector<1x1x2x128xf32>
    tpu.vector_store %arg7[%c0_36, %c4_37, %167, %c0_38], %170 {strides = array<i32>} : memref<1x8x2x128xf32, #tpu.memory_space<vmem>>, vector<1x1x2x128xf32>,
    %171 = vector.broadcast %30 : f32 to vector<2x128xf32>
    %172 = arith.mulf %171, %58 : vector<2x128xf32>
    %173 = vector.broadcast %51 : f32 to vector<2x128xf32>
    %174 = arith.addf %172, %173 : vector<2x128xf32>
    %175 = vector.broadcast %31 : f32 to vector<2x128xf32>
    %176 = arith.mulf %175, %61 : vector<2x128xf32>
    %177 = arith.addf %174, %176 : vector<2x128xf32>
    %178 = vector.broadcast %32 : f32 to vector<2x128xf32>
    %179 = arith.mulf %178, %64 : vector<2x128xf32>
    %180 = arith.addf %177, %179 : vector<2x128xf32>
    %181 = vector.broadcast %33 : f32 to vector<2x128xf32>
    %182 = arith.mulf %181, %67 : vector<2x128xf32>
    %183 = arith.addf %180, %182 : vector<2x128xf32>
    %184 = vector.broadcast %34 : f32 to vector<2x128xf32>
    %185 = arith.mulf %184, %70 : vector<2x128xf32>
    %186 = arith.addf %183, %185 : vector<2x128xf32>
    %c0_39 = arith.constant 0 : index
    %c5_40 = arith.constant 5 : index
    %187 = arith.index_cast %55 : i32 to index
    %c0_41 = arith.constant 0 : index
    %188 = vector.load %arg7[%c0_39, %c5_40, %187, %c0_41] : memref<1x8x2x128xf32, #tpu.memory_space<vmem>>, vector<1x1x2x128xf32>
    %189 = vector.shape_cast %188 : vector<1x1x2x128xf32> to vector<2x128xf32>
    %190 = vector.shape_cast %186 : vector<2x128xf32> to vector<1x1x2x128xf32>
    tpu.vector_store %arg7[%c0_39, %c5_40, %187, %c0_41], %190 {strides = array<i32>} : memref<1x8x2x128xf32, #tpu.memory_space<vmem>>, vector<1x1x2x128xf32>,
    %191 = vector.broadcast %35 : f32 to vector<2x128xf32>
    %192 = arith.mulf %191, %58 : vector<2x128xf32>
    %193 = vector.broadcast %52 : f32 to vector<2x128xf32>
    %194 = arith.addf %192, %193 : vector<2x128xf32>
    %195 = vector.broadcast %36 : f32 to vector<2x128xf32>
    %196 = arith.mulf %195, %61 : vector<2x128xf32>
    %197 = arith.addf %194, %196 : vector<2x128xf32>
    %198 = vector.broadcast %37 : f32 to vector<2x128xf32>
    %199 = arith.mulf %198, %64 : vector<2x128xf32>
    %200 = arith.addf %197, %199 : vector<2x128xf32>
    %201 = vector.broadcast %38 : f32 to vector<2x128xf32>
    %202 = arith.mulf %201, %67 : vector<2x128xf32>
    %203 = arith.addf %200, %202 : vector<2x128xf32>
    %204 = vector.broadcast %39 : f32 to vector<2x128xf32>
    %205 = arith.mulf %204, %70 : vector<2x128xf32>
    %206 = arith.addf %203, %205 : vector<2x128xf32>
    %c0_42 = arith.constant 0 : index
    %c6_43 = arith.constant 6 : index
    %207 = arith.index_cast %55 : i32 to index
    %c0_44 = arith.constant 0 : index
    %208 = vector.load %arg7[%c0_42, %c6_43, %207, %c0_44] : memref<1x8x2x128xf32, #tpu.memory_space<vmem>>, vector<1x1x2x128xf32>
    %209 = vector.shape_cast %208 : vector<1x1x2x128xf32> to vector<2x128xf32>
    %210 = vector.shape_cast %206 : vector<2x128xf32> to vector<1x1x2x128xf32>
    tpu.vector_store %arg7[%c0_42, %c6_43, %207, %c0_44], %210 {strides = array<i32>} : memref<1x8x2x128xf32, #tpu.memory_space<vmem>>, vector<1x1x2x128xf32>,
    %211 = vector.broadcast %40 : f32 to vector<2x128xf32>
    %212 = arith.mulf %211, %58 : vector<2x128xf32>
    %213 = vector.broadcast %53 : f32 to vector<2x128xf32>
    %214 = arith.addf %212, %213 : vector<2x128xf32>
    %215 = vector.broadcast %41 : f32 to vector<2x128xf32>
    %216 = arith.mulf %215, %61 : vector<2x128xf32>
    %217 = arith.addf %214, %216 : vector<2x128xf32>
    %218 = vector.broadcast %42 : f32 to vector<2x128xf32>
    %219 = arith.mulf %218, %64 : vector<2x128xf32>
    %220 = arith.addf %217, %219 : vector<2x128xf32>
    %221 = vector.broadcast %43 : f32 to vector<2x128xf32>
    %222 = arith.mulf %221, %67 : vector<2x128xf32>
    %223 = arith.addf %220, %222 : vector<2x128xf32>
    %224 = vector.broadcast %44 : f32 to vector<2x128xf32>
    %225 = arith.mulf %224, %70 : vector<2x128xf32>
    %226 = arith.addf %223, %225 : vector<2x128xf32>
    %c0_45 = arith.constant 0 : index
    %c7_46 = arith.constant 7 : index
    %227 = arith.index_cast %55 : i32 to index
    %c0_47 = arith.constant 0 : index
    %228 = vector.load %arg7[%c0_45, %c7_46, %227, %c0_47] : memref<1x8x2x128xf32, #tpu.memory_space<vmem>>, vector<1x1x2x128xf32>
    %229 = vector.shape_cast %228 : vector<1x1x2x128xf32> to vector<2x128xf32>
    %230 = vector.shape_cast %226 : vector<2x128xf32> to vector<1x1x2x128xf32>
    tpu.vector_store %arg7[%c0_45, %c7_46, %227, %c0_47], %230 {strides = array<i32>} : memref<1x8x2x128xf32, #tpu.memory_space<vmem>>, vector<1x1x2x128xf32>,
    %231 = vector.broadcast %0 : f32 to vector<2x128xf32>
    %232 = arith.mulf %231, %58 : vector<2x128xf32>
    %233 = vector.broadcast %45 : f32 to vector<2x128xf32>
    %234 = arith.addf %232, %233 : vector<2x128xf32>
    %235 = vector.broadcast %1 : f32 to vector<2x128xf32>
    %236 = arith.mulf %235, %61 : vector<2x128xf32>
    %237 = arith.addf %234, %236 : vector<2x128xf32>
    %238 = vector.broadcast %2 : f32 to vector<2x128xf32>
    %239 = arith.mulf %238, %64 : vector<2x128xf32>
    %240 = arith.addf %237, %239 : vector<2x128xf32>
    %241 = vector.broadcast %3 : f32 to vector<2x128xf32>
    %242 = arith.mulf %241, %67 : vector<2x128xf32>
    %243 = arith.addf %240, %242 : vector<2x128xf32>
    %244 = vector.broadcast %4 : f32 to vector<2x128xf32>
    %245 = arith.mulf %244, %70 : vector<2x128xf32>
    %246 = arith.addf %243, %245 : vector<2x128xf32>
    %cst = arith.constant 0.000000e+00 : f32
    %247 = vector.broadcast %cst : f32 to vector<2x128xf32>
    %248 = arith.cmpf ogt, %67, %247 : vector<2x128xf32>
    %249 = arith.select %248, %67, %246 : vector<2x128xi1>, vector<2x128xf32>
    %c0_48 = arith.constant 0 : index
    %c0_49 = arith.constant 0 : index
    %250 = arith.index_cast %55 : i32 to index
    %c0_50 = arith.constant 0 : index
    %251 = vector.load %arg8[%c0_48, %c0_49, %250, %c0_50] : memref<1x1x2x128xf32, #tpu.memory_space<vmem>>, vector<1x1x2x128xf32>
    %252 = vector.shape_cast %251 : vector<1x1x2x128xf32> to vector<2x128xf32>
    %253 = vector.shape_cast %249 : vector<2x128xf32> to vector<1x1x2x128xf32>
    tpu.vector_store %arg8[%c0_48, %c0_49, %250, %c0_50], %253 {strides = array<i32>} : memref<1x1x2x128xf32, #tpu.memory_space<vmem>>, vector<1x1x2x128xf32>,
    %cst_51 = arith.constant 0.000000e+00 : f32
    %254 = vector.broadcast %cst_51 : f32 to vector<2x128xf32>
    %255 = arith.maximumf %249, %254 : vector<2x128xf32>
    %c0_52 = arith.constant 0 : index
    %c0_53 = arith.constant 0 : index
    %256 = arith.index_cast %55 : i32 to index
    %c0_54 = arith.constant 0 : index
    %257 = vector.load %arg9[%c0_52, %c0_53, %256, %c0_54] : memref<1x1x2x128xf32, #tpu.memory_space<vmem>>, vector<1x1x2x128xf32>
    %258 = vector.shape_cast %257 : vector<1x1x2x128xf32> to vector<2x128xf32>
    %259 = vector.shape_cast %255 : vector<2x128xf32> to vector<1x1x2x128xf32>
    tpu.vector_store %arg9[%c0_52, %c0_53, %256, %c0_54], %259 {strides = array<i32>} : memref<1x1x2x128xf32, #tpu.memory_space<vmem>>, vector<1x1x2x128xf32>,
    %c1_i32 = arith.constant 1 : i32
    return
  }
  func.func @transform_0(%arg0: i32, %arg1: i32) -> (i32, i32, i32, i32) {
    %c0_i32 = arith.constant 0 : i32
    %c0_i32_0 = arith.constant 0 : i32
    %c0_i32_1 = arith.constant 0 : i32
    return %arg0, %c0_i32, %arg1, %c0_i32_0 : i32, i32, i32, i32
  }
  func.func @transform_1(%arg0: i32, %arg1: i32) -> (i32, i32, i32, i32) {
    %c0_i32 = arith.constant 0 : i32
    %c0_i32_0 = arith.constant 0 : i32
    %c0_i32_1 = arith.constant 0 : i32
    return %arg0, %c0_i32, %arg1, %c0_i32_0 : i32, i32, i32, i32
  }
  func.func @transform_2(%arg0: i32, %arg1: i32) -> (i32, i32, i32, i32) {
    %c0_i32 = arith.constant 0 : i32
    %c0_i32_0 = arith.constant 0 : i32
    %c0_i32_1 = arith.constant 0 : i32
    return %arg0, %c0_i32, %arg1, %c0_i32_0 : i32, i32, i32, i32
  }
  func.func @transform_3(%arg0: i32, %arg1: i32) -> i32 {
    %c0_i32 = arith.constant 0 : i32
    %c0_i32_0 = arith.constant 0 : i32
    return %c0_i32 : i32
  }
  func.func @transform_4(%arg0: i32, %arg1: i32) -> i32 {
    %c0_i32 = arith.constant 0 : i32
    %c0_i32_0 = arith.constant 0 : i32
    return %c0_i32 : i32
  }
  func.func @transform_5(%arg0: i32, %arg1: i32) -> (i32, i32, i32, i32) {
    %c0_i32 = arith.constant 0 : i32
    %c0_i32_0 = arith.constant 0 : i32
    %c0_i32_1 = arith.constant 0 : i32
    return %arg0, %c0_i32, %arg1, %c0_i32_0 : i32, i32, i32, i32
  }
  func.func @transform_6(%arg0: i32, %arg1: i32) -> (i32, i32, i32, i32) {
    %c0_i32 = arith.constant 0 : i32
    %c0_i32_0 = arith.constant 0 : i32
    %c0_i32_1 = arith.constant 0 : i32
    return %arg0, %c0_i32, %arg1, %c0_i32_0 : i32, i32, i32, i32
  }
  func.func @transform_7(%arg0: i32, %arg1: i32) -> (i32, i32, i32, i32) {
    %c0_i32 = arith.constant 0 : i32
    %c0_i32_0 = arith.constant 0 : i32
    %c0_i32_1 = arith.constant 0 : i32
    return %arg0, %c0_i32, %arg1, %c0_i32_0 : i32, i32, i32, i32
  }
}

</mosaic_0001>

<bundles_post_ra>
// kernel: tpu_custom_call.1
= control target key start
LH: loop header
LB: loop body
LE: loop exit
PB: predicated region body
PF: predicated region fallthrough
CT: control target
= control target key end

     0   :  { %s1982_s0 = inlined_call_operand.hbm [shape: f32[2,3,2,128], index: 0, kind: input, shape index: {}]   ;;  %s1983_s1 = inlined_call_operand.hbm [shape: f32[2,1,2,128], index: 1, kind: input, shape index: {}]   ;;  %s1984_s2 = inlined_call_operand.vmem [shape: f32[2,1,2,128], index: 2, kind: input, shape index: {}]   ;;  %s1985_s3 = inlined_call_operand.vmem [shape: f32[45], index: 3, kind: input, shape index: {}]   ;;  %s1986_s4 = inlined_call_operand.vmem [shape: f32[9], index: 4, kind: input, shape index: {}]   ;;  %s1987_s5 = inlined_call_operand.hbm [shape: f32[2,8,2,128], index: 5, kind: output, shape index: {0}]   ;;  %s1988_s6 = inlined_call_operand.hbm [shape: f32[2,1,2,128], index: 6, kind: output, shape index: {1}]   ;;  %s1989_s7 = inlined_call_operand.hbm [shape: f32[2,1,2,128], index: 7, kind: output, shape index: {2}]  }
   0x1   :  { %2004 = sst [smem:[#allocation28_spill]] %s1982_s0 }
   0x2   :  { %2005 = sst [smem:[#allocation29_spill]] %s1983_s1 }
   0x3   :  { %2006 = sst [smem:[#allocation30_spill]] %s1984_s2 }
   0x4   :  { %2007 = sst [smem:[#allocation31_spill]] %s1985_s3 }
   0x5   :  { %2008 = sst [smem:[#allocation32_spill]] %s1986_s4 }
   0x6   :  { %13 = vsyncpa [#allocation3], 0 }
   0x7   :  { %15 = vsyncpa [#allocation3 + $0x1], 0 }
   0x8   :  { %16 = vsyncpa [#allocation7], 0 }
   0x9   :  { %18 = vsyncpa [#allocation7 + $0x1], 0 }
   0xa   :  { %19 = vsyncpa [#allocation5], 0 }
   0xb   :  { %20 = vsyncpa [#allocation10], 0 }
   0xc   :  { %21 = vsyncpa [#allocation4], 0 }
   0xd   :  { %23 = vsyncpa [#allocation4 + $0x1], 0 }
   0xe   :  { %24 = vsyncpa [#allocation13], 0 }
   0xf   :  { %26 = vsyncpa [#allocation13 + $0x1], 0  ;;  %s1424_s24 = smov 0   ;;  %s1426_s25 = smov 0  }
  0x10   :  { %s1428_s26 = smov 0   ;;  %s1430_s27 = smov 0  }
  0x11   :  { %s1432_s28 = smov 0   ;;  %s1434_s29 = smov 0  }
  0x12 LB: > { %2009 = sst [smem:[#allocation21_spill]] %s1355_s25  ;;  %s1455_s30 = sadd.s32 4294967295, %s1371_s29   ;;  %s1371_s29 = sphi %s1434_s29, %s32_s29   ;;  %s1367_s28 = sphi %s1432_s28, %s2047_s28   ;;  %s1363_s27 = sphi %s1430_s27, %s2046_s27   ;;  %s1359_s26 = sphi %s1428_s26, %s2045_s26   ;;  %s1355_s25 = sphi %s1426_s25, %s2044_s25   ;;  %s1351_s24 = sphi %s1424_s24, %s2043_s24  }
  0x13   : > { %2010 = sst [smem:[#allocation22_spill]] %s1359_s26  ;;  %s1995_s8 = sadd.s32 4294967294, %s1371_s29  }
  0x14   : > { %2011 = sst [smem:[#allocation23_spill]] %s1367_s28  ;;  %p60_p0 = scmp.ne.s32.totalorder %s1359_s26, %s1355_s25 }
  0x15   : > { %2012 = sst [smem:[#allocation24_spill]] %s1371_s29  ;;  %p61_p1 = scmp.eq.s32.totalorder %s1371_s29, 0 }
  0x16   : > { %p66_p2 = scmp.ne.s32.totalorder %s1355_s25, %s1351_s24  ;;  %p1992_p3 = scmp.eq.s32.totalorder %s1455_s30, 0 }
  0x17   : > { %p190_p4 = scmp.eq.s32.totalorder %s1455_s30, 1  ;;  %p1466_p5 = por %p61_p1, %p60_p0 }
  0x18   : > { %p196_p6 = scmp.eq.s32.totalorder %s1995_s8, 1  ;;  %p1474_p7 = por %p1992_p3, %p66_p2 }
  0x19   : > { %p1478_p8 = por %p190_p4, %p60_p0  ;;  %p936_p10 = scmp.ge.s32.totalorder %s1371_s29, 1 }
  0x1a   : > { %s2014_s11 = scalar_select %p1474_p7, 1, 0 }
  0x1b   : > { %s2015_s12 = scalar_select %p1478_p8, 1, 0 }
  0x1c   : > { %p1482_p9 = por %p196_p6, %p66_p2  ;;  %p259_p11 = scmp.lt.s32.totalorder %s1371_s29, 3 }
  0x1d   : > { %s2018_s3 = sld [smem:[#allocation31_spill]]  ;;  %p1069_p0 = scmp.lt.s32.totalorder %s1371_s29, 2 }
  0x1e   : > { %s2016_s13 = scalar_select %p1482_p9, 1, 0 }
  0x1f   : > { %p1491_p12 = pnand %p936_p10, %p259_p11  ;;  %s2020_s4 = sld [smem:[#allocation32_spill]] }
  0x20   : > { %2017 = sst [smem:[#allocation25_spill]] %s2016_s13  ;;  %p1504_p2 = pnand %p1069_p0, %p1466_p5 }
  0x21   : > { %s2019_s17 = scalar_select %p1491_p12, 1, 0 }
  0x22   : > { %p1043_p1 = pneg %p1491_p12 }
  0x23   : > { %s272_s16 = sshll.u32 %s2018_s3, 4  ;;  %s273_s16 = int_to_ptr.vmem [resolvable:$true] %s272_s16 }
  0x24   : > { %s2021_s21 = scalar_select %p1504_p2, 1, 0 }
  0x25   : > { %s283_s20 = sshll.u32 %s2020_s4, 4  ;;  %p1510_p4 = pnand %p1043_p1, %p1992_p3  ;;  %s284_s20 = int_to_ptr.vmem [resolvable:$true] %s283_s20 }
  0x26   : > { %s1127_s23 = scalar_lea.vmem %s273_s16, 16  ;;  %p1135_p9 = scmp.lt.s32.totalorder %s273_s16, %s273_s16 }
  0x27   : > { %p1128_p6 = scmp.ne.s32.totalorder %s273_s16, %s1127_s23  ;;  %p1129_p10 = pneg %p1510_p4 }
  0x28   : > { %p1136_p8 = scmp.lt.s32.totalorder %s1127_s23, %s1127_s23 }
  0x29   : > { %p1130_p11 = pnand %p1129_p10, %p1128_p6 }
  0x2a   : > { %p1137_p7 = por %p1136_p8, %p1135_p9 }
  0x2b   : > { %p1131_p13 = pneg %p1130_p11 }
  0x2d   : > { %p1138_p5 = pnand %p1137_p7, %p1131_p13 }
  0x2f   : > { %1141 = shalt.err (!%p1138_p5)
}
  0x30   : > { %s1373_s10 = smov [#allocation8]   ;;  %s1142_s14 = scalar_lea.vmem %s284_s20, 16 }
  0x31   : > { %1046 = dma.vmem_to_smem (!%p1510_p4), %s273_s16, 16, %s1373_s10, [#allocation5]  }
  0x32   : > { %p1143_p0 = scmp.ne.s32.totalorder %s284_s20, %s1142_s14  ;;  %p1150_p12 = scmp.lt.s32.totalorder %s284_s20, %s284_s20 }
  0x33   : > { %p1151_p2 = scmp.lt.s32.totalorder %s1142_s14, %s1142_s14 }
  0x34   : > { %p1145_p1 = pnand %p1143_p0, %p1129_p10 }
  0x35   : > { %p1152_p6 = por %p1151_p2, %p1150_p12 }
  0x36   : > { %p1146_p3 = pneg %p1145_p1 }
  0x38   : > { %p1153_p11 = pnand %p1152_p6, %p1146_p3 }
  0x3a   : > { %1156 = shalt.err (!%p1153_p11)
}
  0x3b   : > { %s1374_s15 = smov [#allocation9]   ;;  %s44_s16 = sadd.s32 1, %s1367_s28 }
  0x3c   : > { %1049 = dma.vmem_to_smem (!%p1510_p4), %s284_s20, 16, %s1374_s15, [#allocation10]  }
  0x3d   : > { %s1522_s18 = sand.u32 1, %s1359_s26   ;;  %p46_p7 = scmp.ge.s32.totalorder %s44_s16, 2 }
  0x3e   : > { %s1022_s19 = smul.u32 6, %s1522_s18  ;;  %s2024_s0 = sld [smem:[#allocation28_spill]] }
  0x3f   : > { %s2049_s16 = smov (%p46_p7, %s44_s16), 0  ;;  %s1023_s22 = smul.u32 96, %s1367_s28 }
  0x40   : > { %2023 = sst [smem:[#allocation26_spill]] %s2049_s16  ;;  %s48_s23 = ssub.s32 %s1367_s28, %s2049_s16 }
  0x41   : > { %s298_s10 = scalar_lea.vmem [#allocation2], %s1022_s19  ;;  %p51_p3 = scmp.eq.s32.totalorder %s48_s23, 0 }
  0x42   : > { %s306_s14 = sshll.u32 %s298_s10, 4  ;;  %s2025_s15 = sadd.s32 1, %s1359_s26  ;;  %s1535_s14 = int_to_ptr.vmem [resolvable:$true] %s306_s14 }
  0x43   : > { %s1540_s3 = scalar_select %p51_p3, %s1359_s26, %s2025_s15  }
  0x44   : > { %s1533_s20 = scalar_lea.hbm %s2024_s0, %s1023_s22  ;;  %s295_s4 = scalar_lea.sflag [#allocation3], %s1522_s18 }
  0x45   : > { %2026 = sst [smem:[#allocation27_spill]] %s1540_s3  ;;  %s1157_s29 = scalar_lea.hbm %s1533_s20, 96 }
  0x46   : > { %p1158_p8 = scmp.ne.s32.totalorder %s1533_s20, %s1157_s29  ;;  %p2027_p9 = scmp.ne.s32.totalorder %s2021_s21, 0 }
  0x47   : > { %s1162_s19 = scalar_lea.hbm %s2024_s0, 192  ;;  %p1163_p4 = scmp.lt.u32.totalorder %s1533_s20, %s2024_s0 }
  0x48   : > { %p1159_p12 = pneg %p2027_p9  ;;  %p1164_p10 = scmp.lt.u32.totalorder %s1162_s19, %s1157_s29 }
  0x49   : > { %p1166_p0 = scmp.lt.u32.totalorder %s1157_s29, %s1533_s20 }
  0x4a   : > { %p1160_p13 = pnand %p1159_p12, %p1158_p8  ;;  %p1165_p5 = por %p1164_p10, %p1163_p4 }
  0x4c   : > { %p1161_p2 = pneg %p1160_p13  ;;  %p1167_p1 = por %p1166_p0, %p1165_p5 }
  0x4e   : > { %p1168_p6 = pnand %p1167_p1, %p1161_p2 }
  0x50   : > { %1171 = shalt.err (!%p1168_p6)
}
  0x51   : > { %s1172_s10 = scalar_lea.vmem %s1535_s14, 96  ;;  %s1375_s15 = smov [#allocation2]  }
  0x52   : > { %p1173_p11 = scmp.ne.s32.totalorder %s1535_s14, %s1172_s10  ;;  %s1177_s8 = sshll.u32 %s1375_s15, 4  ;;  %s1178_s8 = int_to_ptr.vmem [resolvable:$false] %s1177_s8 }
  0x53   : > { %s1179_s9 = scalar_lea.vmem %s1178_s8, 192  ;;  %p1180_p8 = scmp.lt.s32.totalorder %s1535_s14, %s1178_s8 }
  0x54   : > { %p1175_p7 = pnand %p1173_p11, %p1159_p12  ;;  %p1181_p13 = scmp.lt.s32.totalorder %s1179_s9, %s1172_s10 }
  0x56   : > { %p1176_p3 = pneg %p1175_p7  ;;  %p1182_p4 = por %p1181_p13, %p1180_p8 }
  0x58   : > { %p1183_p10 = pnand %p1182_p4, %p1176_p3 }
  0x5a   : > { %1186 = shalt.err (!%p1183_p10)
}
  0x5b   : > { %s1376_s29 = smov 32   ;;  %s1377_s19 = smov 2  }
  0x5c   : > { %1053 = dma.hbm_to_vmem [thread:$0]  (!%p2027_p9), %s1533_s20, 96, %s1535_s14, %s295_s4, %s1376_s29, %s1376_s29, %s1377_s19  }
  0x5d   : > { %s941_s22 = sshll.u32 %s1522_s18, 1  ;;  %s942_s23 = sshll.u32 %s1367_s28, 5 }
  0x5e   : > { %s2028_s1 = sld [smem:[#allocation29_spill]]  ;;  %s320_s9 = scalar_lea.vmem [#allocation6], %s941_s22 }
  0x5f   : > { %s328_s0 = sshll.u32 %s320_s9, 4  ;;  %s317_s16 = scalar_lea.sflag [#allocation7], %s1522_s18  ;;  %s329_s0 = int_to_ptr.vmem [resolvable:$true] %s328_s0 }
  0x64   : > { %s1575_s8 = scalar_lea.hbm %s2028_s1, %s942_s23  ;;  %s1192_s20 = scalar_lea.hbm %s2028_s1, 64 }
  0x65   : > { %s1187_s3 = scalar_lea.hbm %s1575_s8, 32  ;;  %p1193_p1 = scmp.lt.u32.totalorder %s1575_s8, %s2028_s1 }
  0x66   : > { %p1188_p2 = scmp.ne.s32.totalorder %s1575_s8, %s1187_s3  ;;  %p1194_p6 = scmp.lt.u32.totalorder %s1192_s20, %s1187_s3 }
  0x67   : > { %p1196_p7 = scmp.lt.u32.totalorder %s1187_s3, %s1575_s8 }
  0x68   : > { %p1190_p5 = pnand %p1188_p2, %p1159_p12  ;;  %p1195_p11 = por %p1194_p6, %p1193_p1 }
  0x6a   : > { %p1191_p0 = pneg %p1190_p5  ;;  %p1197_p3 = por %p1196_p7, %p1195_p11 }
  0x6c   : > { %p1198_p8 = pnand %p1197_p3, %p1191_p0 }
  0x6e   : > { %1201 = shalt.err (!%p1198_p8)
}
  0x6f   : > { %s1202_s18 = scalar_lea.vmem %s329_s0, 32  ;;  %s1378_s22 = smov [#allocation6]  }
  0x70   : > { %p1203_p13 = scmp.ne.s32.totalorder %s329_s0, %s1202_s18  ;;  %s1207_s23 = sshll.u32 %s1378_s22, 4  ;;  %s1208_s23 = int_to_ptr.vmem [resolvable:$false] %s1207_s23 }
  0x71   : > { %s1209_s15 = scalar_lea.vmem %s1208_s23, 64  ;;  %p1210_p2 = scmp.lt.s32.totalorder %s329_s0, %s1208_s23 }
  0x72   : > { %p1205_p4 = pnand %p1203_p13, %p1159_p12  ;;  %p1211_p5 = scmp.lt.s32.totalorder %s1209_s15, %s1202_s18 }
  0x74   : > { %p1206_p10 = pneg %p1205_p4  ;;  %p1212_p1 = por %p1211_p5, %p1210_p2 }
  0x76   : > { %p1213_p6 = pnand %p1212_p1, %p1206_p10 }
  0x78   : > { %1216 = shalt.err (!%p1213_p6)
}
  0x79   : > { %1056 = dma.hbm_to_vmem [thread:$0]  (!%p2027_p9), %s1575_s8, 32, %s329_s0, %s317_s16  }
  0x7a   : > { %p2029_p0 = scmp.ne.s32.totalorder %s2019_s17, 0 }
  0x7b   : > { %s1600_s3 = sand.u32 (!%p2029_p0), 1, %s1355_s25   ;;  %p2030_p12 = scmp.ne.s32.totalorder (!%p2029_p0), %s2014_s11, 0 }
  0x7c   : > { %347 = sbr.rel (%p2029_p0) target bundleno = 251 (0xfb), region = 40  ;;  %s350_s9 = scalar_lea.sflag (!%p2029_p0), [#allocation3], %s1600_s3 }
  0x7d   : > { %s1024_s10 = smul.u32 (!%p2029_p0), 6, %s1600_s3 }
  0x7f   : > { %s353_s4 = scalar_lea.vmem (!%p2029_p0), [#allocation2], %s1024_s10 }
  0x83   : > { %1326 = dma.done.wait (%p2030_p12), %s350_s9, 96  }
  0x84   : > { %1328 = vsyncadd (%p2030_p12), %s350_s9, 4294967200  ;;  %s1609_s0 = sshll.u32 %s1600_s3, 1  ;;  %s359_s17 = scalar_lea.sflag [#allocation7], %s1600_s3 }
  0x85   : > { %s362_s21 = scalar_lea.vmem [#allocation6], %s1609_s0 }
  0x86   : > { %1330 = dma.done.wait (%p2030_p12), %s359_s17, 32  }
  0x87   : > { %1332 = vsyncadd (%p2030_p12), %s359_s17, 4294967264  ;;  %p2031_p9 = scmp.eq.s32.totalorder %s1455_s30, 0 }
  0x89   : > { %1334 = dma.done.wait (%p2031_p9), [#allocation5], 16   ;;  %p2032_p11 = pmov %p2031_p9 }
  0x8a   : > { %p2033_p7 = pmov %p2031_p9 }
  0x8b   : > { %1336 = vsyncadd (%p2032_p11), [#allocation5], 4294967280 }
  0x8c   : > { %1338 = dma.done.wait (%p2033_p7), [#allocation10], 16   ;;  %p2034_p3 = pmov %p2033_p7 }
  0x8e   : > { %1340 = vsyncadd (%p2034_p3), [#allocation10], 4294967280 }
  0x8f   : > { %375 = sfence }
  0x90   : > { %p424_p8 = scmp.lt.s32.totalorder %s1363_s27, 1  ;;  %s431_s16 = sld [smem:[#allocation8]]  ;;  %v1631_v0 = vld [vmem:[%s353_s4] sm:$0x3]  ;;  %v1636_v1 = vld [vmem:[%s353_s4 + $0x2] sm:$0x3] }
  0x91   : > { %s951_s8 = sld [smem:[#allocation8 + $0x1]]  ;;  %s952_s14 = sld [smem:[#allocation8 + $0x2]]  ;;  %v1639_v5 = vld [vmem:[%s353_s4 + $0x4] sm:$0x3]  ;;  %v1650_v8 = vld [vmem:[%s362_s21] sm:$0x3] }
  0x92   : > { %s425_s11 = scalar_select %p424_p8, %s1363_s27, 1  ;;  %vm658_vm0 = vcmp.gt.f32.partialorder %v1650_v8, 0.0 }
  0x93   : > { %s1627_s20 = sld [smem:[#allocation8 + $0x3]]  ;;  %s1629_s19 = sld [smem:[#allocation8 + $0x4]] }
  0x94   : > { %s950_s29 = sshll.u32 %s425_s11, 1  ;;  %s476_s18 = sld [smem:[#allocation9]] }
  0x95   : > { %s2035_s2 = sld [smem:[#allocation30_spill]]  ;;  %s956_s9 = sld [smem:[#allocation8 + $0x6]] }
  0x96   : > { %v642_v2 = vstv %s431_s16  ;;  %s955_s10 = sld [smem:[#allocation8 + $0x5]]  ;;  %s1641_s17 = sld [smem:[#allocation8 + $0x7]] }
  0x97   : > { %v646_v3 = vstv %s951_s8  ;;  %v643_v4 = vmul.f32 %v642_v2, %v1631_v0  ;;  %v649_v6 = vstv %s952_s14  ;;  %s1643_s11 = sld [smem:[#allocation8 + $0x8]]  ;;  %s995_s22 = sld [smem:[#allocation9 + $0x1]] }
  0x98   : > { %v647_v7 = vmul.f32 %v1636_v1, %v646_v3  ;;  %s1653_s16 = sld [smem:[#allocation8 + $0xa]]  ;;  %v650_v12 = vmul.f32 %v1639_v5, %v649_v6  ;;  %s1656_s4 = sld [smem:[#allocation8 + $0xb]] }
  0x99   : > { %v652_v10 = vstv %s1627_s20  ;;  %v655_v14 = vstv %s1629_s19  ;;  %s1661_s8 = sld [smem:[#allocation8 + $0xc]]  ;;  %s1663_s14 = sld [smem:[#allocation8 + $0xd]] }
  0x9a   : > { %v644_v9 = vstv %s476_s18  ;;  %v653_v16 = vmul.f32 %v652_v10, %v1650_v8  ;;  %s1666_s21 = sld [smem:[#allocation8 + $0xe]]  ;;  %s1668_s20 = sld [smem:[#allocation9 + $0x2]] }
  0x9b   : > { %s430_s15 = scalar_lea.vmem %s2035_s2, %s950_s29  ;;  %s1646_s29 = sld [smem:[#allocation8 + $0x9]]  ;;  %v645_v11 = vadd.f32 %v644_v9, %v643_v4  ;;  %v498_v18 = vstv %s956_s9 }
  0x9c   : > { %v1658_v13 = vld [vmem:[%s430_s15] sm:$0x3]  ;;  %v494_v17 = vstv %s955_s10  ;;  %v499_v20 = vmul.f32 %v1636_v1, %v498_v18  ;;  %v501_v21 = vstv %s1641_s17  ;;  %s1674_s19 = sld [smem:[#allocation8 + $0xf]]  ;;  %s1676_s18 = sld [smem:[#allocation8 + $0x10]] }
  0x9d   : > { %v648_v15 = vadd.f32 %v647_v7, %v645_v11  ;;  %v495_v19 = vmul.f32 %v494_v17, %v1631_v0  ;;  %v504_v22 = vstv %s1643_s11  ;;  %v656_v24 = vmul.f32 %v655_v14, %v1658_v13  ;;  %s1680_s23 = sld [smem:[#allocation8 + $0x11]]  ;;  %s1682_s15 = sld [smem:[#allocation8 + $0x12]] }
  0x9e   : > { %v496_v25 = vstv %s995_s22  ;;  %v502_v27 = vmul.f32 %v1639_v5, %v501_v21  ;;  %v511_v29 = vstv %s1653_s16  ;;  %s1687_s10 = sld [smem:[#allocation8 + $0x13]]  ;;  %s416_s17 = scalar_lea.vmem [#allocation12], %s1609_s0  ;;  %v505_v31 = vmul.f32 %v504_v22, %v1650_v8 }
  0x9f   : > { %v651_v23 = vadd.f32 %v650_v12, %v648_v15  ;;  %v497_v26 = vadd.f32 %v496_v25, %v495_v19  ;;  %s1689_s9 = sld [smem:[#allocation9 + $0x3]]  ;;  %s1692_s11 = sshll.u32 %s416_s17, 4  ;;  %v512_v32 = vmul.f32 %v511_v29, %v1631_v0  ;;  %v515_v33 = vstv %s1656_s4  ;;  %s1773_s11 = int_to_ptr.vmem [resolvable:$true] %s1692_s11 }
  0xa0   : > { %s1697_s22 = sld [smem:[#allocation8 + $0x14]]  ;;  %v516_v35 = vmul.f32 %v1636_v1, %v515_v33  ;;  %v518_v36 = vstv %s1661_s8  ;;  %v521_v37 = vstv %s1663_s14  ;;  %s1704_s16 = sld [smem:[#allocation8 + $0x16]]  ;;  %v513_v40 = vstv %s1668_s20 }
  0xa1   : > { %v507_v28 = vstv %s1646_s29  ;;  %v654_v30 = vadd.f32 %v653_v16, %v651_v23  ;;  %v500_v34 = vadd.f32 %v499_v20, %v497_v26  ;;  %s1702_s29 = sld [smem:[#allocation8 + $0x15]]  ;;  %v519_v41 = vmul.f32 %v1639_v5, %v518_v36  ;;  %s1709_s4 = sld [smem:[#allocation8 + $0x17]] }
  0xa2   : > { %v508_v39 = vmul.f32 %v507_v28, %v1658_v13  ;;  %s1711_s1 = sld [smem:[#allocation9 + $0x4]]  ;;  %s947_s2 = sshll.u32 %s1600_s3, 4  ;;  %v514_v43 = vadd.f32 %v513_v40, %v512_v32  ;;  %v524_v44 = vstv %s1666_s21  ;;  %v529_v45 = vstv %s1674_s19 }
  0xa3   : > { %v657_v38 = vadd.f32 %v656_v24, %v654_v30  ;;  %v503_v42 = vadd.f32 %v502_v27, %v500_v34  ;;  %s1716_s8 = sld [smem:[#allocation8 + $0x18]]  ;;  %v522_v47 = vmul.f32 %v521_v37, %v1650_v8  ;;  %v530_v48 = vmul.f32 %v529_v45, %v1631_v0  ;;  %s1726_s14 = sld [smem:[#allocation8 + $0x19]] }
  0xa4   : > { %v533_v49 = vstv %s1676_s18  ;;  %s1728_s20 = sld [smem:[#allocation8 + $0x1a]]  ;;  %v517_v51 = vadd.f32 %v516_v35, %v514_v43  ;;  %s1733_s21 = sld [smem:[#allocation8 + $0x1b]]  ;;  %v525_v54 = vmul.f32 %v524_v44, %v1658_v13  ;;  %v536_v56 = vstv %s1680_s23 }
  0xa5   : > { %v1721_v46 = vsel %vm658_vm0, %v1650_v8, %v657_v38  ;;  %v506_v50 = vadd.f32 %v505_v31, %v503_v42  ;;  %v531_v52 = vstv %s1689_s9  ;;  %v534_v53 = vmul.f32 %v1636_v1, %v533_v49  ;;  %s1735_s19 = sld [smem:[#allocation9 + $0x5]]  ;;  %s1740_s18 = sld [smem:[#allocation8 + $0x1c]] }
  0xa6   : > { %660 = vst [vmem:[%s416_s17] sm:$0x3] %v1721_v46  ;;  %v532_v55 = vadd.f32 %v531_v52, %v530_v48  ;;  %v539_v57 = vstv %s1682_s15  ;;  %v520_v59 = vadd.f32 %v519_v41, %v517_v51  ;;  %v537_v60 = vmul.f32 %v1639_v5, %v536_v56  ;;  %s1744_s9 = sld [smem:[#allocation8 + $0x1d]]  ;;  %s1746_s17 = sld [smem:[#allocation8 + $0x1e]] }
  0xa7   : > { %v509_v58 = vadd.f32 %v508_v39, %v506_v50  ;;  %v542_v61 = vstv %s1687_s10  ;;  %v540_v63 = vmul.f32 %v539_v57, %v1650_v8  ;;  %v547_v2 = vstv %s1697_s22  ;;  %s1751_s23 = sld [smem:[#allocation8 + $0x1f]]  ;;  %s1753_s15 = sld [smem:[#allocation9 + $0x6]] }
  0xa8   : > { %v535_v62 = vadd.f32 %v534_v53, %v532_v55  ;;  %v549_v3 = vstv %s1711_s1  ;;  %s1757_s28 = scalar_lea.vmem [#allocation11], %s947_s2  ;;  %v523_v4 = vadd.f32 %v522_v47, %v520_v59  ;;  %v548_v6 = vmul.f32 %v547_v2, %v1631_v0  ;;  %s1763_s10 = sld [smem:[#allocation8 + $0x20]] }
  0xa9   : > { %510 = vst [vmem:[%s1757_s28] sm:$0x3] %v509_v58  ;;  %v551_v7 = vstv %s1702_s29  ;;  %v554_v9 = vstv %s1704_s16  ;;  %v543_v11 = vmul.f32 %v542_v61, %v1658_v13  ;;  %v557_v14 = vstv %s1709_s4  ;;  %s1768_s1 = sld [smem:[#allocation8 + $0x21]]  ;;  %s1770_s2 = sld [smem:[#allocation8 + $0x23]] }
  0xaa   : > { %v538_v10 = vadd.f32 %v537_v60, %v535_v62  ;;  %v552_v12 = vmul.f32 %v1636_v1, %v551_v7  ;;  %v526_v15 = vadd.f32 %v525_v54, %v523_v4  ;;  %v550_v16 = vadd.f32 %v549_v3, %v548_v6  ;;  %s1777_s22 = sld [smem:[#allocation8 + $0x22]]  ;;  %s1782_s29 = sld [smem:[#allocation8 + $0x24]] }
  0xab   : > { %v555_v17 = vmul.f32 %v1639_v5, %v554_v9  ;;  %v560_v18 = vstv %s1716_s8  ;;  %v558_v20 = vmul.f32 %v557_v14, %v1650_v8  ;;  %v566_v21 = vstv %s1726_s14  ;;  %s1784_s16 = sld [smem:[#allocation9 + $0x7]]  ;;  %s1790_s4 = sld [smem:[#allocation8 + $0x25]] }
  0xac   : > { %v541_v19 = vadd.f32 %v540_v63, %v538_v10  ;;  %v568_v22 = vstv %s1735_s19  ;;  %1005 = vst [vmem:[%s1757_s28 + $0x2] sm:$0x3] %v526_v15  ;;  %v553_v23 = vadd.f32 %v552_v12, %v550_v16  ;;  %v567_v24 = vmul.f32 %v566_v21, %v1631_v0  ;;  %s1792_s8 = sld [smem:[#allocation8 + $0x26]]  ;;  %s1797_s14 = sld [smem:[#allocation8 + $0x27]] }
  0xad   : > { %v570_v25 = vstv %s1728_s20  ;;  %v573_v26 = vstv %s1733_s21  ;;  %v561_v28 = vmul.f32 %v560_v18, %v1658_v13  ;;  %v576_v30 = vstv %s1740_s18  ;;  %s1799_s19 = sld [smem:[#allocation8 + $0x28]]  ;;  %s1803_s20 = sld [smem:[#allocation8 + $0x29]] }
  0xae   : > { %v544_v27 = vadd.f32 %v543_v11, %v541_v19  ;;  %v571_v29 = vmul.f32 %v1636_v1, %v570_v25  ;;  %v556_v31 = vadd.f32 %v555_v17, %v553_v23  ;;  %v569_v32 = vadd.f32 %v568_v22, %v567_v24  ;;  %s668_s21 = sand.u32 1, %s1455_s30   ;;  %s1811_s18 = sld [smem:[#allocation9 + $0x8]] }
  0xaf   : > { %v574_v33 = vmul.f32 %v1639_v5, %v573_v26  ;;  %v579_v34 = vstv %s1744_s9  ;;  %v577_v35 = vmul.f32 %v576_v30, %v1650_v8  ;;  %v585_v36 = vstv %s1746_s17  ;;  %s1815_s30 = sld [smem:[#allocation8 + $0x2a]]  ;;  %s2003_s9 = sshll.u32 %s1363_s27, 5 }
  0xb0   : > { %1006 = vst [vmem:[%s1757_s28 + $0x4] sm:$0x3] %v544_v27  ;;  %v587_v37 = vstv %s1753_s15  ;;  %v589_v38 = vstv %s1751_s23  ;;  %v559_v39 = vadd.f32 %v558_v20, %v556_v31  ;;  %v572_v40 = vadd.f32 %v571_v29, %v569_v32  ;;  %s1822_s17 = sld [smem:[#allocation8 + $0x2b]]  ;;  %s1829_s26 = scalar_lea.hbm %s1988_s6, %s2003_s9 }
  0xb1   : > { %v586_v41 = vmul.f32 %v585_v36, %v1631_v0  ;;  %v590_v42 = vmul.f32 %v1636_v1, %v589_v38  ;;  %v580_v43 = vmul.f32 %v579_v34, %v1658_v13  ;;  %v592_v44 = vstv %s1763_s10  ;;  %s1832_s25 = scalar_lea.sflag [#allocation13], %s668_s21  ;;  %s1217_s13 = scalar_lea.vmem %s1773_s11, 32 }
  0xb2   : > { %v595_v45 = vstv %s1768_s1  ;;  %v604_v47 = vstv %s1770_s2  ;;  %v562_v48 = vadd.f32 %v561_v28, %v559_v39  ;;  %v575_v49 = vadd.f32 %v574_v33, %v572_v40  ;;  %p1218_p13 = scmp.ne.s32.totalorder %s1773_s11, %s1217_s13  ;;  %p2036_p4 = scmp.ne.s32.totalorder %s2015_s12, 0 }
  0xb3   : > { %v588_v50 = vadd.f32 %v587_v37, %v586_v41  ;;  %v593_v51 = vmul.f32 %v1639_v5, %v592_v44  ;;  %s1379_s10 = smov [#allocation12]  }
  0xb4   : > { %p1219_p10 = pnand %p1218_p13, %p2036_p4  ;;  %s1221_s1 = sshll.u32 %s1379_s10, 4  ;;  %s1222_s1 = int_to_ptr.vmem [resolvable:$false] %s1221_s1 }
  0xb5   : > { %s1223_s2 = scalar_lea.vmem %s1222_s1, 64  ;;  %p1224_p5 = scmp.lt.s32.totalorder %s1773_s11, %s1222_s1 }
  0xb6   : > { %p1220_p2 = pneg %p1219_p10  ;;  %p1225_p1 = scmp.lt.s32.totalorder %s1223_s2, %s1217_s13 }
  0xb8   : > { %p1226_p6 = por %p1225_p1, %p1224_p5 }
  0xba   : > { %p1227_p0 = pnand %p1226_p6, %p1220_p2 }
  0xbc   : > { %1230 = shalt.err (!%p1227_p0)
}
  0xbd   : > { %s1231_s21 = scalar_lea.hbm %s1829_s26, 32  ;;  %s1235_s10 = scalar_lea.hbm %s1988_s6, 64 }
  0xbe   : > { %p1232_p12 = scmp.ne.s32.totalorder %s1829_s26, %s1231_s21  ;;  %p1236_p7 = scmp.lt.u32.totalorder %s1829_s26, %s1988_s6 }
  0xbf   : > { %p1237_p3 = scmp.lt.u32.totalorder %s1235_s10, %s1231_s21  ;;  %p1239_p13 = scmp.lt.u32.totalorder %s1231_s21, %s1829_s26 }
  0xc0   : > { %p1233_p9 = pnand %p1232_p12, %p2036_p4 }
  0xc1   : > { %p1238_p8 = por %p1237_p3, %p1236_p7 }
  0xc2   : > { %p1234_p11 = pneg %p1233_p9 }
  0xc3   : > { %p1240_p10 = por %p1239_p13, %p1238_p8 }
  0xc5   : > { %p1241_p2 = pnand %p1240_p10, %p1234_p11 }
  0xc7   : > { %1244 = shalt.err (!%p1241_p2)
}
  0xc8   : > { %1038 = dma.vmem_to_hbm [thread:$0]  (%p2036_p4), %s1773_s11, 32, %s1829_s26, %s1832_s25   ;;  %v596_v52 = vmul.f32 %v595_v45, %v1650_v8  ;;  %v598_v53 = vstv %s1777_s22  ;;  %v605_v54 = vmul.f32 %v604_v47, %v1631_v0  ;;  %v606_v55 = vstv %s1784_s16  ;;  %1007 = vst [vmem:[%s1757_s28 + $0x6] sm:$0x3] %v562_v48 }
  0xc9   : > { %s1860_s13 = sld [smem:[#allocation8 + $0x2c]]  ;;  %v578_v56 = vadd.f32 %v577_v35, %v575_v49  ;;  %v591_v57 = vadd.f32 %v590_v42, %v588_v50  ;;  %v608_v58 = vstv %s1782_s29  ;;  %v611_v59 = vstv %s1790_s4  ;;  %s423_s26 = scalar_lea.vmem [#allocation14], %s1609_s0 }
  0xca   : > { %v607_v60 = vadd.f32 %v606_v55, %v605_v54  ;;  %v609_v61 = vmul.f32 %v1636_v1, %v608_v58  ;;  %v612_v62 = vmul.f32 %v1639_v5, %v611_v59  ;;  %v614_v63 = vstv %s1792_s8  ;;  %s719_s11 = sshll.u32 %s423_s26, 4  ;;  %s2037_s0 = sshll.u32 %s1363_s27, 5  ;;  %s1884_s11 = int_to_ptr.vmem [resolvable:$true] %s719_s11 }
  0xcb   : > { %v581_v2 = vadd.f32 %v580_v43, %v578_v56  ;;  %v594_v3 = vadd.f32 %v593_v51, %v591_v57  ;;  %v599_v4 = vmul.f32 %v598_v53, %v1658_v13  ;;  %v617_v6 = vstv %s1797_s14  ;;  %s1891_s16 = scalar_lea.hbm %s1989_s7, %s2037_s0  ;;  %s688_s4 = sshll.u32 %s1757_s28, 4  ;;  %s1923_s4 = int_to_ptr.vmem [resolvable:$true] %s688_s4 }
  0xcc   : > { %v610_v7 = vadd.f32 %v609_v61, %v607_v60  ;;  %v615_v9 = vmul.f32 %v614_v63, %v1650_v8  ;;  %v623_v10 = vstv %s1799_s19  ;;  %v625_v11 = vstv %s1811_s18  ;;  %s1021_s8 = sshll.u32 %s1363_s27, 8  ;;  %s1245_s14 = scalar_lea.vmem %s1884_s11, 32 }
  0xcd   : > { %1008 = vst [vmem:[%s1757_s28 + $0x8] sm:$0x3] %v581_v2  ;;  %v597_v12 = vadd.f32 %v596_v52, %v594_v3  ;;  %v624_v14 = vmul.f32 %v623_v10, %v1631_v0  ;;  %v627_v15 = vstv %s1803_s20  ;;  %v630_v16 = vstv %s1815_s30  ;;  %p1246_p5 = scmp.ne.s32.totalorder %s1884_s11, %s1245_s14  ;;  %s1380_s19 = smov [#allocation14]  }
  0xce   : > { %v613_v17 = vadd.f32 %v612_v62, %v610_v7  ;;  %v618_v18 = vmul.f32 %v617_v6, %v1658_v13  ;;  %v628_v19 = vmul.f32 %v1636_v1, %v627_v15  ;;  %v633_v20 = vstv %s1822_s17  ;;  %s1249_s20 = sshll.u32 %s1380_s19, 4  ;;  %s1250_s20 = int_to_ptr.vmem [resolvable:$false] %s1249_s20 }
  0xcf   : > { %v600_v21 = vadd.f32 %v599_v4, %v597_v12  ;;  %v626_v22 = vadd.f32 %v625_v11, %v624_v14  ;;  %v631_v23 = vmul.f32 %v1639_v5, %v630_v16  ;;  %v636_v0 = vstv %s1860_s13  ;;  %p1247_p1 = pnand %p1246_p5, %p2036_p4  ;;  %s1251_s18 = scalar_lea.vmem %s1250_s20, 64 }
  0xd0   : > { %v616_v24 = vadd.f32 %v615_v9, %v613_v17  ;;  %v661_v25 = vmax.f32 %v1721_v46, 0.0  ;;  %v634_v5 = vmul.f32 %v633_v20, %v1650_v8  ;;  %v637_v27 = vmul.f32 %v636_v0, %v1658_v13  ;;  %p1252_p0 = scmp.lt.s32.totalorder %s1884_s11, %s1250_s20  ;;  %p1253_p12 = scmp.lt.s32.totalorder %s1251_s18, %s1245_s14 }
  0xd1   : > { %1009 = vst [vmem:[%s1757_s28 + $0xa] sm:$0x3] %v600_v21  ;;  %v629_v1 = vadd.f32 %v628_v19, %v626_v22  ;;  %p1248_p6 = pneg %p1247_p1 }
  0xd2   : > { %v619_v26 = vadd.f32 %v618_v18, %v616_v24  ;;  %662 = vst [vmem:[%s423_s26] sm:$0x3] %v661_v25  ;;  %p1254_p9 = por %p1253_p12, %p1252_p0 }
  0xd3   : > { %v632_v46 = vadd.f32 %v631_v23, %v629_v1 }
  0xd4   : > { %p1255_p11 = pnand %p1254_p9, %p1248_p6 }
  0xd6   : > { %1258 = shalt.err (!%p1255_p11)
}
  0xd7   : > { %s1259_s30 = scalar_lea.hbm %s1891_s16, 32  ;;  %s1263_s2 = scalar_lea.hbm %s1989_s7, 64 }
  0xd8   : > { %p1260_p7 = scmp.ne.s32.totalorder %s1891_s16, %s1259_s30  ;;  %p1264_p13 = scmp.lt.u32.totalorder %s1891_s16, %s1989_s7 }
  0xd9   : > { %p1265_p10 = scmp.lt.u32.totalorder %s1263_s2, %s1259_s30  ;;  %p1267_p5 = scmp.lt.u32.totalorder %s1259_s30, %s1891_s16 }
  0xda   : > { %p1261_p3 = pnand %p1260_p7, %p2036_p4 }
  0xdb   : > { %p1266_p2 = por %p1265_p10, %p1264_p13 }
  0xdc   : > { %p1262_p8 = pneg %p1261_p3 }
  0xdd   : > { %p1268_p1 = por %p1267_p5, %p1266_p2 }
  0xdf   : > { %p1269_p6 = pnand %p1268_p1, %p1262_p8 }
  0xe1   : > { %1272 = shalt.err (!%p1269_p6)
}
  0xe2   : > { %1039 = dma.vmem_to_hbm [thread:$0]  (%p2036_p4), %s1884_s11, 32, %s1891_s16, %s1832_s25   ;;  %1010 = vst [vmem:[%s1757_s28 + $0xc] sm:$0x3] %v619_v26  ;;  %v635_v8 = vadd.f32 %v634_v5, %v632_v46 }
  0xe3   : > { %s1930_s1 = scalar_lea.hbm %s1987_s5, %s1021_s8  ;;  %s664_s13 = scalar_lea.sflag [#allocation4], %s1600_s3 }
  0xe4   : > { %v638_v13 = vadd.f32 %v637_v27, %v635_v8  ;;  %s1273_s26 = scalar_lea.vmem %s1923_s4, 256  ;;  %s1381_s25 = smov [#allocation11]  }
  0xe5   : > { %p1274_p0 = scmp.ne.s32.totalorder %s1923_s4, %s1273_s26  ;;  %s1277_s11 = sshll.u32 %s1381_s25, 4  ;;  %s1278_s11 = int_to_ptr.vmem [resolvable:$false] %s1277_s11 }
  0xe6   : > { %1011 = vst [vmem:[%s1757_s28 + $0xe] sm:$0x3] %v638_v13  ;;  %s1279_s0 = scalar_lea.vmem %s1278_s11, 512  ;;  %p1280_p11 = scmp.lt.s32.totalorder %s1923_s4, %s1278_s11 }
  0xe7   : > { %p1275_p12 = pnand %p1274_p0, %p2036_p4  ;;  %p1281_p7 = scmp.lt.s32.totalorder %s1279_s0, %s1273_s26 }
  0xe9   : > { %p1276_p9 = pneg %p1275_p12  ;;  %p1282_p3 = por %p1281_p7, %p1280_p11 }
  0xeb   : > { %p1283_p8 = pnand %p1282_p3, %p1276_p9 }
  0xed   : > { %1286 = shalt.err (!%p1283_p8)
}
  0xee   : > { %s1287_s27 = scalar_lea.hbm %s1930_s1, 256  ;;  %s1291_s29 = scalar_lea.hbm %s1987_s5, 512 }
  0xef   : > { %p1288_p13 = scmp.ne.s32.totalorder %s1930_s1, %s1287_s27  ;;  %p1292_p5 = scmp.lt.u32.totalorder %s1930_s1, %s1987_s5 }
  0xf0   : > { %p1293_p1 = scmp.lt.u32.totalorder %s1291_s29, %s1287_s27  ;;  %p1295_p0 = scmp.lt.u32.totalorder %s1287_s27, %s1930_s1 }
  0xf1   : > { %p1289_p10 = pnand %p1288_p13, %p2036_p4 }
  0xf2   : > { %p1294_p6 = por %p1293_p1, %p1292_p5 }
  0xf3   : > { %p1290_p2 = pneg %p1289_p10 }
  0xf4   : > { %p1296_p12 = por %p1295_p0, %p1294_p6 }
  0xf6   : > { %p1297_p9 = pnand %p1296_p12, %p1290_p2 }
  0xf8   : > { %1300 = shalt.err (!%p1297_p9)
}
  0xf9   : > { %s1382_s14 = smov 32   ;;  %s1383_s19 = smov 2  }
  0xfa   : > { %1037 = dma.vmem_to_hbm [thread:$0]  (%p2036_p4), %s1923_s4, 256, %s1930_s1, %s664_s13, %s1382_s14, %s1382_s14, %s1383_s19  }
  0xfb PF: > { %s2038_s20 = sld [smem:[#allocation25_spill]]  ;;  %s2039_s18 = sld [smem:[#allocation24_spill]] }
  0xfc   : > { %s731_s30 = sand.u32 1, %s1351_s24  }
  0xfd   : > { %s732_s9 = scalar_lea.sflag [#allocation4], %s731_s30 }
 0x101   : > { %p2040_p11 = scmp.ne.s32.totalorder %s2038_s20, 0  ;;  %p2041_p7 = scmp.ge.s32.totalorder %s2039_s18, 2 }
 0x103   : > { %p1058_p3 = pnand %p2041_p7, %p2040_p11 }
 0x105   : > { %1342 = dma.done.wait (!%p1058_p3), %s732_s9, 256  }
 0x106   : > { %1344 = vsyncadd (!%p1058_p3), %s732_s9, 4294967040  ;;  %s2042_s17 = sadd.s32 4294967294, %s2039_s18  }
 0x107   : > { %s740_s2 = sand.u32 1, %s2042_s17  }
 0x108   : > { %s741_s21 = scalar_lea.sflag [#allocation13], %s740_s2 }
 0x109   : > { %1346 = dma.done.wait (!%p1058_p3), %s741_s21, 64  }
 0x10a   : > { %1348 = vsyncadd (!%p1058_p3), %s741_s21, 4294967232  ;;  %s32_s29 = sadd.s32 1, %s2039_s18   ;;  %s2043_s24 = sld [smem:[#allocation21_spill]] }
 0x10b   : > { %p29_p4 = scmp.ge.s32.totalorder %s32_s29, 4   ;;  %s2044_s25 = sld [smem:[#allocation22_spill]] }
 0x10c   : > { %s2045_s26 = sld [smem:[#allocation27_spill]]  ;;  %s2046_s27 = sld [smem:[#allocation23_spill]] }
 0x10d   : > { %s2047_s28 = sld [smem:[#allocation26_spill]]  ;;  %31 = sbr.rel (!%p29_p4) target bundleno = 18 (0x12), region = 151 }
 0x114   :  { %755 = vsyncpa [#allocation3], 1 }
 0x115   :  { %757 = vsyncpa [#allocation3 + $0x1], 1 }
 0x116   :  { %758 = vsyncpa [#allocation7], 1 }
 0x117   :  { %760 = vsyncpa [#allocation7 + $0x1], 1 }
 0x118   :  { %761 = vsyncpa [#allocation4], 1 }
 0x119   :  { %763 = vsyncpa [#allocation4 + $0x1], 1 }
 0x11a   :  { %764 = vsyncpa [#allocation13], 1 }
 0x11b   :  { %766 = vsyncpa [#allocation13 + $0x1], 1 }
 0x11c   :  { %767 = vsyncpa [#allocation5], 1 }
 0x11d   :  { %769 = vsyncpa [#allocation5 + $0x1], 1 }
 0x11e   :  { %770 = vsyncpa [#allocation10], 1 }

</bundles_post_ra>
